<compile_context>
chip_gen: v7x
topology: tpu7x:2x2x1
jax: 0.10.0
libtpu: 0.0.40
codegen_flags: <defaults>
</compile_context>

<pallas_src>
import functools

import jax
import jax.numpy as jnp
from jax.experimental import pallas as pl
from jax.experimental.pallas import tpu as pltpu


# ----------------------------- Pallas kernel ------------------------------ #
def factorized_stream_kernel(x_ref, w1_ref, bias_ref, w2_ref, seg_ref, out_ref,
                             *, hidden3, b2_offset):
    # Fused first layer (value | speed | direction): one MXU launch + ReLU.
    b1 = bias_ref[:, :hidden3]                            # (1, 3H) f32
    h = jnp.maximum(
        jnp.dot(x_ref[...].astype(w1_ref.dtype), w1_ref[...],
                preferred_element_type=jnp.float32) + b1,
        0.0,
    )                                                      # (B, 3H) f32

    # Fused second layer with dueling mean-centering and value broadcast
    # already folded into the packed weights: emits q directly, lane-dense
    # (B, (S+D)*A) = (B, 256).
    b2 = bias_ref[:, b2_offset:]                           # (1, 256) f32
    q = jnp.dot(h.astype(w2_ref.dtype), w2_ref[...],
                preferred_element_type=jnp.float32) + b2   # (B, 256) f32

    # Softmax over each action's A-atom segment.  A shared per-row shift is
    # mathematically equivalent to the per-action max (softmax is invariant to
    # any per-(batch,action) constant); the denom clamp below guards the
    # (out-of-scale) underflow case so it can never produce NaN/Inf.
    m = jnp.max(q, axis=-1, keepdims=True)                 # (B, 1)
    e = jnp.exp(q - m)                                     # (B, 256) f32

    # Per-action denominators, broadcast back to lane-dense form, via one
    # segmented-sum matmul against a 0/1 block matrix (MXU, not XLU).
    denom = jnp.dot(e.astype(seg_ref.dtype), seg_ref[...],
                    preferred_element_type=jnp.float32)    # (B, 256)
    denom = jnp.maximum(denom, 1e-30)

    r = pl.reciprocal(denom, approx=True)                  # EUP slot
    r = r * (2.0 - denom * r)                              # 1 Newton step

    out_ref[...] = (e * r).astype(out_ref.dtype)


# ------------------------------ param packing ------------------------------ #
def pack_params(params, weight_dtype=jnp.bfloat16):
    """Fold the dueling head into 2 fused matmuls + 1 segment matrix (once)."""
    (vW1, vb1, vW2, vb2,
     sW1, sb1, sW2, sb2,
     dW1, db1, dW2, db2) = params

    H = vW1.shape[1]
    A = vW2.shape[1]
    S = sW2.shape[0]
    D = dW2.shape[0]
    O = (S + D) * A

    # ---- fused first layer: (input_dim, 3H), bias (1, 3H) ----
    w1c = jnp.concatenate([vW1, sW1, dW1], axis=1)
    b1c = jnp.concatenate([vb1, sb1, db1], axis=1)

    # ---- fused second layer with dueling algebra folded in ----
    # q[a] = value + (adv[a] - mean_a' adv[a'])
    sW2c = sW2 - sW2.mean(axis=0, keepdims=True)           # (S, H, A)
    dW2c = dW2 - dW2.mean(axis=0, keepdims=True)           # (D, H, A)
    sb2c = sb2 - sb2.mean(axis=0, keepdims=True)           # (S, 1, A)
    db2c = db2 - db2.mean(axis=0, keepdims=True)           # (D, 1, A)

    w2_eff = jnp.zeros((3 * H, O), jnp.float32)
    # value block: replicated into every action's atom block
    w2_eff = w2_eff.at[0:H, :].set(jnp.tile(vW2, (1, S + D)))
    # speed advantage block (pre-centered), columns [0, S*A)
    w2_eff = w2_eff.at[H:2 * H, 0:S * A].set(
        jnp.transpose(sW2c, (1, 0, 2)).reshape(H, S * A))
    # direction advantage block (pre-centered), columns [S*A, O)
    w2_eff = w2_eff.at[2 * H:, S * A:].set(
        jnp.transpose(dW2c, (1, 0, 2)).reshape(H, D * A))

    adv_b = jnp.concatenate([sb2c.reshape(S * A), db2c.reshape(D * A)])
    b2_eff = (jnp.tile(vb2.reshape(A), (S + D,)) + adv_b).reshape(1, O)

    # ---- merged bias operand: [b1 (3H) | pad | b2_eff (O)], b2 lane-aligned ----
    b2_off = ((3 * H + 127) // 128) * 128
    bias = jnp.zeros((1, b2_off + O), jnp.float32)
    bias = bias.at[:, :3 * H].set(b1c)
    bias = bias.at[:, b2_off:].set(b2_eff)

    # ---- segment (0/1) matrix for the per-action softmax denominator ----
    idx = jnp.arange(O) // A
    seg = (idx[:, None] == idx[None, :]).astype(weight_dtype)   # (O, O)

    packed = (w1c.astype(weight_dtype), bias,
              w2_eff.astype(weight_dtype), seg)
    return packed, (A, S, D)


# ------------------------------- wrapper ----------------------------------- #
def factorized_stream(x, packed, dims):
    w1c, bias, w2_eff, seg = packed
    A, S, D = dims
    B, In = x.shape
    H3 = w1c.shape[1]
    O = (S + D) * A
    b2_off = bias.shape[1] - O

    flops = 2 * B * (In * H3 + H3 * O + O * O)
    bytes_accessed = (sum(int(a.size) * a.dtype.itemsize
                          for a in (x, w1c, bias, w2_eff, seg))
                      + B * O * 4)
    cost = pl.CostEstimate(flops=flops, transcendentals=B * O,
                           bytes_accessed=bytes_accessed)

    vmem = pl.BlockSpec(memory_space=pltpu.MemorySpace.VMEM)
    out = pl.pallas_call(
        functools.partial(factorized_stream_kernel,
                          hidden3=H3, b2_offset=b2_off),
        out_shape=jax.ShapeDtypeStruct((B, O), jnp.float32),
        in_specs=[vmem] * 5,
        out_specs=vmem,
        cost_estimate=cost,
    )(x, w1c, bias, w2_eff, seg)

    # Free reshapes back to the PyTorch convention (B, num_actions, num_atoms).
    probabilities_speed = out[:, :S * A].reshape(B, S, A)
    probabilities_direction = out[:, S * A:].reshape(B, D, A)
    return probabilities_speed, probabilities_direction


# --------------------------- pure-JAX reference ---------------------------- #
def factorized_stream_ref(x, params):
    (vW1, vb1, vW2, vb2,
     sW1, sb1, sW2, sb2,
     dW1, db1, dW2, db2) = params
    B = x.shape[0]
    A = vW2.shape[-1]

    hv = jax.nn.relu(x @ vW1 + vb1)
    value = (hv @ vW2 + vb2).reshape(B, 1, A)

    def adv(W1, b1, W2, b2):
        h = jax.nn.relu(x @ W1 + b1)
        a = jnp.einsum("bh,sha->bsa", h, W2) + b2[None, :, 0, :]
        return a - a.mean(axis=1, keepdims=True)

    q_speed = value + adv(sW1, sb1, sW2, sb2)
    q_dir = value + adv(dW1, db1, dW2, db2)
    return jax.nn.softmax(q_speed, axis=2), jax.nn.softmax(q_dir, axis=2)


# ------------------------------ param setup -------------------------------- #
def init_params(key, input_dim, hidden, num_atoms, n_speed, n_dir):
    ks = jax.random.split(key, 12)
    s = 0.1

    def lin(k, shape):
        return jax.random.normal(k, shape, dtype=jnp.float32) * s

    vW1 = lin(ks[0], (input_dim, hidden));  vb1 = lin(ks[1], (1, hidden))
    vW2 = lin(ks[2], (hidden, num_atoms));  vb2 = lin(ks[3], (1, num_atoms))

    sW1 = lin(ks[4], (input_dim, hidden));  sb1 = lin(ks[5], (1, hidden))
    sW2 = lin(ks[6], (n_speed, hidden, num_atoms))
    sb2 = lin(ks[7], (n_speed, 1, num_atoms))

    dW1 = lin(ks[8], (input_dim, hidden));  db1 = lin(ks[9], (1, hidden))
    dW2 = lin(ks[10], (n_dir, hidden, num_atoms))
    db2 = lin(ks[11], (n_dir, 1, num_atoms))

    return (vW1, vb1, vW2, vb2, sW1, sb1, sW2, sb2, dW1, db1, dW2, db2)


if __name__ == "__main__":
    batch = 8
    input_dim = 32
    hidden = 64
    num_atoms = 32
    n_speed_actions = 3
    n_direction_actions = 5

    key = jax.random.PRNGKey(0)
    kx, kp = jax.random.split(key)
    x = jax.random.normal(kx, (batch, input_dim), dtype=jnp.float32)
    params = init_params(kp, input_dim, hidden, num_atoms,
                         n_speed_actions, n_direction_actions)
    packed, dims = pack_params(params)

    p_speed, p_dir = factorized_stream(x, packed, dims)
    jax.block_until_ready((p_speed, p_dir))

    # sanity check against the pure-JAX reference (tolerances account for the
    # bf16 weight operands + approx reciprocal w/ one Newton step)
    r_speed, r_dir = factorized_stream_ref(x, params)
    assert p_speed.shape == (batch, n_speed_actions, num_atoms)
    assert p_dir.shape == (batch, n_direction_actions, num_atoms)
    assert jnp.allclose(p_speed, r_speed, atol=3e-3, rtol=3e-2)
    assert jnp.allclose(p_dir, r_dir, atol=3e-3, rtol=3e-2)
    # softmax rows sum to 1 (bf16-rounded denominator -> ~0.2% worst case)
    assert jnp.allclose(p_speed.sum(-1), 1.0, atol=5e-3)
    assert jnp.allclose(p_dir.sum(-1), 1.0, atol=5e-3)

    print("KERNEL_OK")
</pallas_src>

<mosaic_0001>
module attributes {stable_mosaic.version = 11 : i64} {
  func.func @factorized_stream_kernel(%arg0: memref<8x32xf32, #tpu.memory_space<vmem>>, %arg1: memref<32x192xbf16, #tpu.memory_space<vmem>>, %arg2: memref<1x512xf32, #tpu.memory_space<vmem>>, %arg3: memref<192x256xbf16, #tpu.memory_space<vmem>>, %arg4: memref<256x256xbf16, #tpu.memory_space<vmem>>, %arg5: memref<8x256xf32, #tpu.memory_space<vmem>>) attributes {dimension_semantics = [], scalar_prefetch = 0 : i64, scratch_operands = 0 : i64, tpu.core_type = #tpu.core_type<tc>} {
    %c0 = arith.constant 0 : index
    %c0_0 = arith.constant 0 : index
    %0 = vector.load %arg2[%c0, %c0_0] : memref<1x512xf32, #tpu.memory_space<vmem>>, vector<1x192xf32>
    %c0_1 = arith.constant 0 : index
    %c0_2 = arith.constant 0 : index
    %1 = vector.load %arg0[%c0_1, %c0_2] : memref<8x32xf32, #tpu.memory_space<vmem>>, vector<8x32xf32>
    %2 = arith.truncf %1 : vector<8x32xf32> to vector<8x32xbf16>
    %c0_3 = arith.constant 0 : index
    %c0_4 = arith.constant 0 : index
    %3 = vector.load %arg1[%c0_3, %c0_4] : memref<32x192xbf16, #tpu.memory_space<vmem>>, vector<32x192xbf16>
    %cst = arith.constant dense<0.000000e+00> : vector<8x192xf32>
    %4 = tpu.matmul %2, %3, %cst {dimension_numbers = #tpu.dot_dimension_numbers<[1], [0], [0], [1], [0, 0, 1, 1], [], []>} : vector<8x32xbf16>, vector<32x192xbf16>, vector<8x192xf32> -> vector<8x192xf32>
    %5 = vector.broadcast %0 : vector<1x192xf32> to vector<8x192xf32>
    %6 = arith.addf %4, %5 : vector<8x192xf32>
    %cst_5 = arith.constant 0.000000e+00 : f32
    %7 = vector.broadcast %cst_5 : f32 to vector<8x192xf32>
    %8 = arith.maximumf %6, %7 : vector<8x192xf32>
    %c0_6 = arith.constant 0 : index
    %c256 = arith.constant 256 : index
    %9 = vector.load %arg2[%c0_6, %c256] : memref<1x512xf32, #tpu.memory_space<vmem>>, vector<1x256xf32>
    %10 = arith.truncf %8 : vector<8x192xf32> to vector<8x192xbf16>
    %c0_7 = arith.constant 0 : index
    %c0_8 = arith.constant 0 : index
    %11 = vector.load %arg3[%c0_7, %c0_8] : memref<192x256xbf16, #tpu.memory_space<vmem>>, vector<192x256xbf16>
    %cst_9 = arith.constant dense<0.000000e+00> : vector<8x256xf32>
    %12 = tpu.matmul %10, %11, %cst_9 {dimension_numbers = #tpu.dot_dimension_numbers<[1], [0], [0], [1], [0, 0, 1, 1], [], []>} : vector<8x192xbf16>, vector<192x256xbf16>, vector<8x256xf32> -> vector<8x256xf32>
    %13 = vector.broadcast %9 : vector<1x256xf32> to vector<8x256xf32>
    %14 = arith.addf %12, %13 : vector<8x256xf32>
    %cst_10 = arith.constant dense<0xFF800000> : vector<8xf32>
    %15 = vector.multi_reduction <maximumf>, %14, %cst_10 [1] : vector<8x256xf32> to vector<8xf32>
    %16 = vector.shape_cast %15 : vector<8xf32> to vector<8x1xf32>
    %17 = vector.broadcast %16 : vector<8x1xf32> to vector<8x256xf32>
    %18 = arith.subf %14, %17 : vector<8x256xf32>
    %19 = math.exp %18 : vector<8x256xf32>
    %20 = arith.truncf %19 : vector<8x256xf32> to vector<8x256xbf16>
    %c0_11 = arith.constant 0 : index
    %c0_12 = arith.constant 0 : index
    %21 = vector.load %arg4[%c0_11, %c0_12] : memref<256x256xbf16, #tpu.memory_space<vmem>>, vector<256x256xbf16>
    %cst_13 = arith.constant dense<0.000000e+00> : vector<8x256xf32>
    %22 = tpu.matmul %20, %21, %cst_13 {dimension_numbers = #tpu.dot_dimension_numbers<[1], [0], [0], [1], [0, 0, 1, 1], [], []>} : vector<8x256xbf16>, vector<256x256xbf16>, vector<8x256xf32> -> vector<8x256xf32>
    %cst_14 = arith.constant 1.000000e-30 : f32
    %23 = vector.broadcast %cst_14 : f32 to vector<8x256xf32>
    %24 = arith.maximumf %22, %23 : vector<8x256xf32>
    %25 = tpu.reciprocal %24 {approx = true} : vector<8x256xf32> -> vector<8x256xf32>
    %26 = arith.mulf %24, %25 : vector<8x256xf32>
    %cst_15 = arith.constant 2.000000e+00 : f32
    %27 = vector.broadcast %cst_15 : f32 to vector<8x256xf32>
    %28 = arith.subf %27, %26 : vector<8x256xf32>
    %29 = arith.mulf %25, %28 : vector<8x256xf32>
    %30 = arith.mulf %19, %29 : vector<8x256xf32>
    %c0_16 = arith.constant 0 : index
    %c0_17 = arith.constant 0 : index
    %31 = vector.load %arg5[%c0_16, %c0_17] : memref<8x256xf32, #tpu.memory_space<vmem>>, vector<8x256xf32>
    tpu.vector_store %arg5[%c0_16, %c0_17], %30 {strides = array<i32>} : memref<8x256xf32, #tpu.memory_space<vmem>>, vector<8x256xf32>,
    return
  }
}

</mosaic_0001>

<bundles_post_ra>
// kernel: tpu_custom_call.1
= control target key start
LH: loop header
LB: loop body
LE: loop exit
PB: predicated region body
PF: predicated region fallthrough
CT: control target
= control target key end

     0   :  { %10 = vsyncpa [#allocation3], 0  ;;  %s1049_s0 = inlined_call_operand.hbm [shape: f32[8,32], index: 0, kind: input, shape index: {}]   ;;  %s1050_s1 = inlined_call_operand.hbm [shape: bf16[32,192], index: 1, kind: input, shape index: {}]   ;;  %s1051_s2 = inlined_call_operand.vmem [shape: f32[1,512], index: 2, kind: input, shape index: {}]   ;;  %s1052_s3 = inlined_call_operand.hbm [shape: bf16[192,256], index: 3, kind: input, shape index: {}]   ;;  %s1053_s4 = inlined_call_operand.hbm [shape: bf16[256,256], index: 4, kind: input, shape index: {}]   ;;  %s1054_s5 = inlined_call_operand.hbm [shape: f32[8,256], index: 5, kind: output, shape index: {}]  }
   0x1   :  { %11 = vsyncpa [#allocation6], 0 }
   0x2   :  { %12 = vsyncpa [#allocation9], 0 }
   0x3   :  { %13 = vsyncpa [#allocation4], 0  ;;  %s924_s18 = smov [#allocation5]   ;;  %s806_s22 = scalar_lea.hbm %s1050_s1, 512 }
   0x4   :  { %s29_s19 = sshll.u32 %s924_s18, 4  ;;  %p807_p0 = scmp.ne.s32.totalorder %s1050_s1, %s806_s22  ;;  %s30_s19 = int_to_ptr.vmem [resolvable:$true] %s29_s19 }
   0x5   :  { %p810_p1 = scmp.lt.u32.totalorder %s806_s22, %s1050_s1 }
   0x7   :  { %p812_p2 = pnand %p810_p1, %p807_p0 }
   0x9   :  { %815 = shalt.err (!%p812_p2)
}
   0xa   :  { %s816_s27 = scalar_lea.vmem %s30_s19, 512  ;;  %p821_p4 = scmp.lt.s32.totalorder %s30_s19, %s30_s19 }
   0xb   :  { %p817_p3 = scmp.ne.s32.totalorder %s30_s19, %s816_s27  ;;  %p822_p5 = scmp.lt.s32.totalorder %s816_s27, %s816_s27 }
   0xd   :  { %p823_p6 = por %p822_p5, %p821_p4 }
   0xf   :  { %p824_p7 = pnand %p823_p6, %p817_p3 }
  0x11   :  { %827 = shalt.err (!%p824_p7)
}
  0x12   :  { %s925_s28 = smov 128   ;;  %s926_s29 = smov 8  }
  0x13   :  { %35 = dma.hbm_to_vmem [thread:$0]  %s1050_s1, 512, %s30_s19, [#allocation6], %s925_s28, %s925_s28, %s926_s29  }
  0x14   :  { %s927_s7 = smov [#allocation2]   ;;  %s928_s9 = smov [#allocation7]  }
  0x15   :  { %s20_s8 = sshll.u32 %s927_s7, 4  ;;  %s43_s10 = sshll.u32 %s928_s9, 4  ;;  %s21_s8 = int_to_ptr.vmem [resolvable:$true] %s20_s8  ;;  %s44_s10 = int_to_ptr.vmem [resolvable:$true] %s43_s10 }
  0x16   :  { %s828_s13 = scalar_lea.hbm %s1049_s0, 128 }
  0x17   :  { %p829_p8 = scmp.ne.s32.totalorder %s1049_s0, %s828_s13  ;;  %p832_p9 = scmp.lt.u32.totalorder %s828_s13, %s1049_s0 }
  0x19   :  { %p834_p10 = pnand %p832_p9, %p829_p8 }
  0x1b   :  { %837 = shalt.err (!%p834_p10)
}
  0x1c   :  { %s838_s1 = scalar_lea.vmem %s21_s8, 128  ;;  %p843_p12 = scmp.lt.s32.totalorder %s21_s8, %s21_s8 }
  0x1d   :  { %p839_p11 = scmp.ne.s32.totalorder %s21_s8, %s838_s1  ;;  %p844_p13 = scmp.lt.s32.totalorder %s838_s1, %s838_s1 }
  0x1f   :  { %p845_p0 = por %p844_p13, %p843_p12 }
  0x21   :  { %p846_p1 = pnand %p845_p0, %p839_p11 }
  0x23   :  { %849 = shalt.err (!%p846_p1)
}
  0x24   :  { %23 = dma.hbm_to_vmem [thread:$0]  %s1049_s0, 128, %s21_s8, [#allocation3]  }
  0x25   :  { %s850_s22 = scalar_lea.hbm %s1052_s3, 3072 }
  0x26   :  { %p851_p2 = scmp.ne.s32.totalorder %s1052_s3, %s850_s22  ;;  %p854_p3 = scmp.lt.u32.totalorder %s850_s22, %s1052_s3 }
  0x28   :  { %p856_p4 = pnand %p854_p3, %p851_p2 }
  0x2a   :  { %859 = shalt.err (!%p856_p4)
}
  0x2b   :  { %s860_s27 = scalar_lea.vmem %s44_s10, 3072  ;;  %p865_p6 = scmp.lt.s32.totalorder %s44_s10, %s44_s10 }
  0x2c   :  { %p861_p5 = scmp.ne.s32.totalorder %s44_s10, %s860_s27  ;;  %p866_p7 = scmp.lt.s32.totalorder %s860_s27, %s860_s27 }
  0x2e   :  { %p867_p8 = por %p866_p7, %p865_p6 }
  0x30   :  { %p868_p9 = pnand %p867_p8, %p861_p5 }
  0x32   :  { %871 = shalt.err (!%p868_p9)
}
  0x33   :  { %49 = dma.hbm_to_vmem [thread:$0]  %s1052_s3, 3072, %s44_s10, [#allocation6], %s925_s28, %s925_s28, %s926_s29  }
  0x34   :  { %s929_s6 = smov [#allocation8]   ;;  %s872_s11 = scalar_lea.hbm %s1053_s4, 4096 }
  0x35   :  { %s55_s7 = sshll.u32 %s929_s6, 4  ;;  %p873_p10 = scmp.ne.s32.totalorder %s1053_s4, %s872_s11  ;;  %s56_s7 = int_to_ptr.vmem [resolvable:$true] %s55_s7 }
  0x36   :  { %p876_p11 = scmp.lt.u32.totalorder %s872_s11, %s1053_s4 }
  0x38   :  { %p878_p12 = pnand %p876_p11, %p873_p10 }
  0x3a   :  { %881 = shalt.err (!%p878_p12)
}
  0x3b   :  { %s882_s16 = scalar_lea.vmem %s56_s7, 4096  ;;  %p887_p0 = scmp.lt.s32.totalorder %s56_s7, %s56_s7 }
  0x3c   :  { %p883_p13 = scmp.ne.s32.totalorder %s56_s7, %s882_s16  ;;  %p888_p1 = scmp.lt.s32.totalorder %s882_s16, %s882_s16 }
  0x3e   :  { %p889_p2 = por %p888_p1, %p887_p0 }
  0x40   :  { %p890_p3 = pnand %p889_p2, %p883_p13 }
  0x42   :  { %893 = shalt.err (!%p890_p3)
}
  0x43   :  { %61 = dma.hbm_to_vmem [thread:$0]  %s1053_s4, 4096, %s56_s7, [#allocation9], %s925_s28, %s925_s28, %s926_s29  }
  0x44   :  { %916 = dma.done.wait [#allocation3], 128  }
  0x45   :  { %917 = vsyncadd [#allocation3], 4294967168 }
  0x46   :  { %918 = dma.done.wait [#allocation6], 3584  }
  0x47   :  { %919 = vsyncadd [#allocation6], 4294963712 }
  0x48   :  { %920 = dma.done.wait [#allocation9], 4096  }
  0x49   :  { %921 = vsyncadd [#allocation9], 4294963200  ;;  %v930_v0 = vmov 0   ;;  %v708_v1 = vld [vmem:[#allocation5 + $0x4] ss:$8 sps:$4 sm:$0xff]   ;;  %v76_v5 = vld [vmem:[#allocation2] sm:$0xff]  ;;  %v83_v31 = vlaneseq }
  0x4a   :  { %149 = vmatprep.mubr.bf16.mxu1 %v930_v0  ;;  %v710_v2 = vld [vmem:[#allocation5] ss:$8 sps:$4 sm:$0xff]   ;;  %117 = vmatprep.subr.bf16.mxu1 %v708_v1  ;;  %v711_v3 = vld [vmem:[#allocation5 + $0x14] ss:$8 sps:$4 sm:$0xff]   ;;  %v713_v4 = vld [vmem:[#allocation5 + $0x10] ss:$8 sps:$4 sm:$0xff]   ;;  %v77_v7 = vpack.c.bf16 %v76_v5, %v76_v5 }
  0x4b   :  { %118 = vmatpush1.bf16.msra.mxu1 %v710_v2  ;;  %v716_v6 = vld [vmem:[#allocation7 + $0x4] ss:$8 sps:$4 sm:$0xff]   ;;  %vm113_vm0 = vcmask 261120   ;;  %v714_v8 = vld [vmem:[#allocation7] ss:$8 sps:$4 sm:$0xff]   ;;  %v1019_v32 = vshrl.u32 %v83_v31, 7 }
  0x4c   :  { %119 = vmatprep.subr.bf16.mxu1 %v711_v3  ;;  %v719_v9 = vld [vmem:[#allocation7 + $0x14] ss:$8 sps:$4 sm:$0xff]   ;;  %v717_v10 = vld [vmem:[#allocation7 + $0x10] ss:$8 sps:$4 sm:$0xff]   ;;  %v722_v11 = vld [vmem:[#allocation7 + $0x24] ss:$8 sps:$4 sm:$0xff]  }
  0x4d   :  { %v720_v12 = vld [vmem:[#allocation7 + $0x20] ss:$8 sps:$4 sm:$0xff]   ;;  %v725_v13 = vld [vmem:[#allocation7 + $0x34] ss:$8 sps:$4 sm:$0xff]   ;;  %v723_v14 = vld [vmem:[#allocation7 + $0x30] ss:$8 sps:$4 sm:$0xff]  }
  0x4e   :  { %v728_v15 = vld [vmem:[#allocation7 + $0x44] ss:$8 sps:$4 sm:$0xff]   ;;  %v726_v16 = vld [vmem:[#allocation7 + $0x40] ss:$8 sps:$4 sm:$0xff]   ;;  %v731_v17 = vld [vmem:[#allocation7 + $0x54] ss:$8 sps:$4 sm:$0xff]  }
  0x4f   :  { %120 = vmatpush1.bf16.msra.mxu1 %v713_v4  ;;  %v729_v18 = vld [vmem:[#allocation7 + $0x50] ss:$8 sps:$4 sm:$0xff]   ;;  %v734_v19 = vld [vmem:[#allocation7 + $0x64] ss:$8 sps:$4 sm:$0xff]   ;;  %v732_v20 = vld [vmem:[#allocation7 + $0x60] ss:$8 sps:$4 sm:$0xff]  }
  0x50   :  { %322 = vmatprep.subr.bf16.mxu1 %v716_v6  ;;  %v737_v21 = vld [vmem:[#allocation7 + $0x74] ss:$8 sps:$4 sm:$0xff]   ;;  %v735_v22 = vld [vmem:[#allocation7 + $0x70] ss:$8 sps:$4 sm:$0xff]   ;;  %v740_v23 = vld [vmem:[#allocation7 + $0x84] ss:$8 sps:$4 sm:$0xff]  }
  0x51   :  { %v738_v24 = vld [vmem:[#allocation7 + $0x80] ss:$8 sps:$4 sm:$0xff]   ;;  %v743_v25 = vld [vmem:[#allocation7 + $0x94] ss:$8 sps:$4 sm:$0xff]   ;;  %v741_v26 = vld [vmem:[#allocation7 + $0x90] ss:$8 sps:$4 sm:$0xff]  }
  0x52   :  { %642 = vmatmul.mubr.msk.bf16.vlgmr.msra.gmra.mrb[0].mxu1 %vm113_vm0, %v77_v7  ;;  %v746_v27 = vld [vmem:[#allocation7 + $0xa4] ss:$8 sps:$4 sm:$0xff]   ;;  %v744_v28 = vld [vmem:[#allocation7 + $0xa0] ss:$8 sps:$4 sm:$0xff]   ;;  %v749_v29 = vld [vmem:[#allocation7 + $0xb4] ss:$8 sps:$4 sm:$0xff]  }
  0x53   :  { %323 = vmatpush1.bf16.msra.mxu1 %v714_v8  ;;  %v747_v30 = vld [vmem:[#allocation7 + $0xb0] ss:$8 sps:$4 sm:$0xff]   ;;  %v85_v33 = vsub.s32 0, %v1019_v32  ;;  %v89_v35 = vsub.s32 1, %v1019_v32  ;;  %vm318_vm1 = vcmask 523264  }
  0x54   :  { %324 = vmatprep.subr.bf16.mxu1 %v719_v9  ;;  %v75_v34 = vld [vmem:[%s1051_s2] sm:$0x3]  ;;  %v750_v48 = vld [vmem:[#allocation8 + $0x4] ss:$8 sps:$4 sm:$0xff]   ;;  %v752_v49 = vld [vmem:[#allocation8] ss:$8 sps:$4 sm:$0xff]  }
  0x55   :  { %v86_v36 = vrot.slane %v75_v34, %v85_v33  ;;  %v90_v37 = vrot.slane %v75_v34, %v89_v35  ;;  %v753_v50 = vld [vmem:[#allocation8 + $0x14] ss:$8 sps:$4 sm:$0xff]   ;;  %566 = vmatprep.subr.bf16.mxu0 %v750_v48  ;;  %v755_v51 = vld [vmem:[#allocation8 + $0x10] ss:$8 sps:$4 sm:$0xff]   ;;  %v756_v52 = vld [vmem:[#allocation8 + $0x24] ss:$8 sps:$4 sm:$0xff]  }
  0x56   :  { %567 = vmatpush1.bf16.msra.mxu0 %v752_v49  ;;  %v758_v53 = vld [vmem:[#allocation8 + $0x20] ss:$8 sps:$4 sm:$0xff]   ;;  %v759_v54 = vld [vmem:[#allocation8 + $0x34] ss:$8 sps:$4 sm:$0xff]   ;;  %v761_v55 = vld [vmem:[#allocation8 + $0x30] ss:$8 sps:$4 sm:$0xff]  }
  0x57   :  { %325 = vmatpush1.bf16.msra.mxu1 %v717_v10  ;;  %568 = vmatprep.subr.bf16.mxu0 %v753_v50  ;;  %v762_v56 = vld [vmem:[#allocation8 + $0x44] ss:$8 sps:$4 sm:$0xff]   ;;  %v764_v57 = vld [vmem:[#allocation8 + $0x40] ss:$8 sps:$4 sm:$0xff]   ;;  %v765_v58 = vld [vmem:[#allocation8 + $0x54] ss:$8 sps:$4 sm:$0xff]  }
  0x58   :  { %326 = vmatprep.subr.bf16.mxu1 %v722_v11  ;;  %v767_v59 = vld [vmem:[#allocation8 + $0x50] ss:$8 sps:$4 sm:$0xff]   ;;  %v768_v60 = vld [vmem:[#allocation8 + $0x64] ss:$8 sps:$4 sm:$0xff]   ;;  %v770_v61 = vld [vmem:[#allocation8 + $0x60] ss:$8 sps:$4 sm:$0xff]  }
  0x59   :  { %v771_v62 = vld [vmem:[#allocation8 + $0x74] ss:$8 sps:$4 sm:$0xff]   ;;  %v773_v63 = vld [vmem:[#allocation8 + $0x70] ss:$8 sps:$4 sm:$0xff]   ;;  %v774_v0 = vld [vmem:[#allocation8 + $0x84] ss:$8 sps:$4 sm:$0xff]  }
  0x5a   :  { %569 = vmatpush1.bf16.msra.mxu0 %v755_v51  ;;  %v776_v1 = vld [vmem:[#allocation8 + $0x80] ss:$8 sps:$4 sm:$0xff]   ;;  %v777_v2 = vld [vmem:[#allocation8 + $0x94] ss:$8 sps:$4 sm:$0xff]   ;;  %v779_v3 = vld [vmem:[#allocation8 + $0x90] ss:$8 sps:$4 sm:$0xff]  }
  0x5b   :  { %327 = vmatpush1.bf16.msra.mxu1 %v720_v12  ;;  %570 = vmatprep.subr.bf16.mxu0 %v756_v52  ;;  %v780_v4 = vld [vmem:[#allocation8 + $0xa4] ss:$8 sps:$4 sm:$0xff]   ;;  %v782_v5 = vld [vmem:[#allocation8 + $0xa0] ss:$8 sps:$4 sm:$0xff]   ;;  %v783_v6 = vld [vmem:[#allocation8 + $0xb4] ss:$8 sps:$4 sm:$0xff]  }
  0x5c   :  { %328 = vmatprep.subr.bf16.mxu1 %v725_v13  ;;  %v160_v7 = vld [vmem:[%s1051_s2 + $0x2] sm:$0x3]  ;;  %s931_s2 = smov [#allocation10]  }
  0x5d   :  { %v191_v8 = vrot.slane %v160_v7, %v85_v33  ;;  %v195_v9 = vrot.slane %v160_v7, %v89_v35  ;;  %s627_s1 = sshll.u32 %s931_s2, 4  ;;  %s628_s1 = int_to_ptr.vmem [resolvable:$true] %s627_s1 }
  0x5e   :  { %571 = vmatpush1.bf16.msra.mxu0 %v758_v53  ;;  %s894_s18 = scalar_lea.vmem %s628_s1, 256  ;;  %p899_p5 = scmp.lt.s32.totalorder %s628_s1, %s628_s1 }
  0x5f   :  { %329 = vmatpush1.bf16.msra.mxu1 %v723_v14  ;;  %572 = vmatprep.subr.bf16.mxu0 %v759_v54  ;;  %p895_p4 = scmp.ne.s32.totalorder %s628_s1, %s894_s18  ;;  %p900_p6 = scmp.lt.s32.totalorder %s894_s18, %s894_s18 }
  0x60   :  { %330 = vmatprep.subr.bf16.mxu1 %v728_v15 }
  0x61   :  { %p901_p7 = por %p900_p6, %p899_p5 }
  0x62   :  { %573 = vmatpush1.bf16.msra.mxu0 %v761_v55 }
  0x63   :  { %331 = vmatpush1.bf16.msra.mxu1 %v726_v16  ;;  %574 = vmatprep.subr.bf16.mxu0 %v762_v56  ;;  %p902_p8 = pnand %p901_p7, %p895_p4 }
  0x64   :  { %332 = vmatprep.subr.bf16.mxu1 %v731_v17  ;;  %v785_v17 = vld [vmem:[#allocation8 + $0xb0] ss:$8 sps:$4 sm:$0xff]  }
  0x66   :  { %575 = vmatpush1.bf16.msra.mxu0 %v764_v57 }
  0x67   :  { %333 = vmatpush1.bf16.msra.mxu1 %v729_v18  ;;  %576 = vmatprep.subr.bf16.mxu0 %v765_v58  ;;  %v786_v18 = vld [vmem:[#allocation8 + $0xc4] ss:$8 sps:$4 sm:$0xff]  }
  0x68   :  { %334 = vmatprep.subr.bf16.mxu1 %v734_v19  ;;  %v788_v19 = vld [vmem:[#allocation8 + $0xc0] ss:$8 sps:$4 sm:$0xff]  }
  0x6a   :  { %577 = vmatpush1.bf16.msra.mxu0 %v767_v59 }
  0x6b   :  { %335 = vmatpush1.bf16.msra.mxu1 %v732_v20  ;;  %578 = vmatprep.subr.bf16.mxu0 %v768_v60  ;;  %v789_v20 = vld [vmem:[#allocation8 + $0xd4] ss:$8 sps:$4 sm:$0xff]  }
  0x6c   :  { %336 = vmatprep.subr.bf16.mxu1 %v737_v21  ;;  %v791_v21 = vld [vmem:[#allocation8 + $0xd0] ss:$8 sps:$4 sm:$0xff]  }
  0x6e   :  { %579 = vmatpush1.bf16.msra.mxu0 %v770_v61 }
  0x6f   :  { %337 = vmatpush1.bf16.msra.mxu1 %v735_v22  ;;  %580 = vmatprep.subr.bf16.mxu0 %v771_v62  ;;  %v792_v22 = vld [vmem:[#allocation8 + $0xe4] ss:$8 sps:$4 sm:$0xff]  }
  0x70   :  { %338 = vmatprep.subr.bf16.mxu1 %v740_v23  ;;  %v794_v23 = vld [vmem:[#allocation8 + $0xe0] ss:$8 sps:$4 sm:$0xff]  }
  0x72   :  { %581 = vmatpush1.bf16.msra.mxu0 %v773_v63 }
  0x73   :  { %339 = vmatpush1.bf16.msra.mxu1 %v738_v24  ;;  %582 = vmatprep.subr.bf16.mxu0 %v774_v0  ;;  %v795_v24 = vld [vmem:[#allocation8 + $0xf4] ss:$8 sps:$4 sm:$0xff]  }
  0x74   :  { %340 = vmatprep.subr.bf16.mxu1 %v743_v25  ;;  %v797_v25 = vld [vmem:[#allocation8 + $0xf0] ss:$8 sps:$4 sm:$0xff]  }
  0x76   :  { %583 = vmatpush1.bf16.msra.mxu0 %v776_v1 }
  0x77   :  { %341 = vmatpush1.bf16.msra.mxu1 %v741_v26  ;;  %584 = vmatprep.subr.bf16.mxu0 %v777_v2 }
  0x78   :  { %342 = vmatprep.subr.bf16.mxu1 %v746_v27 }
  0x7a   :  { %585 = vmatpush1.bf16.msra.mxu0 %v779_v3 }
  0x7b   :  { %343 = vmatpush1.bf16.msra.mxu1 %v744_v28  ;;  %586 = vmatprep.subr.bf16.mxu0 %v780_v4 }
  0x7c   :  { %344 = vmatprep.subr.bf16.mxu1 %v749_v29 }
  0x7e   :  { %587 = vmatpush1.bf16.msra.mxu0 %v782_v5 }
  0x7f   :  { %345 = vmatpush1.bf16.msra.mxu1 %v747_v30  ;;  %588 = vmatprep.subr.bf16.mxu0 %v783_v6 }
  0x82   :  { %589 = vmatpush1.bf16.msra.mxu0 %v785_v17 }
  0x83   :  { %590 = vmatprep.subr.bf16.mxu0 %v786_v18 }
  0x86   :  { %591 = vmatpush1.bf16.msra.mxu0 %v788_v19 }
  0x87   :  { %592 = vmatprep.subr.bf16.mxu0 %v789_v20 }
  0x8a   :  { %593 = vmatpush1.bf16.msra.mxu0 %v791_v21 }
  0x8b   :  { %594 = vmatprep.subr.bf16.mxu0 %v792_v22 }
  0x8e   :  { %595 = vmatpush1.bf16.msra.mxu0 %v794_v23 }
  0x8f   :  { %596 = vmatprep.subr.bf16.mxu0 %v795_v24 }
  0x92   :  { %597 = vmatpush1.bf16.msra.mxu0 %v797_v25 }
 0x125   :  { %v151_v38 = vpop.f32.mrb[0].mxu1 }
 0x126   :  { %v152_v39 = vadd.f32 %v151_v38, %v86_v36  ;;  %v153_v40 = vpop.f32.mrb[1].mxu1 }
 0x127   :  { %v154_v41 = vadd.f32 %v153_v40, %v90_v37  ;;  %v155_v42 = vpop.f32.mrb[2].mxu1 }
 0x128   :  { %v158_v43 = vmax.f32 %v152_v39, 0.0  ;;  %v156_v44 = vpop.f32.mrb[3].mxu1 }
 0x129   :  { %v159_v45 = vmax.f32 %v154_v41, 0.0 }
 0x12a   :  { %v161_v47 = vpack.c.bf16 %v158_v43, %v158_v43 }
 0x12b   :  { %v162_v46 = vpack.c.bf16 %v159_v45, %v159_v45 }
 0x12d   :  { %667 = vmatprep.mubr.msk.bf16.mxu1 %vm318_vm1, %v162_v46 }
 0x12e   :  { %355 = vmatmul.mubr.bf16.vlgmr.msra.gmra.mrb[4].mxu1 %v161_v47 }
 0x201   :  { %v356_v10 = vpop.f32.mrb[4].mxu1 }
 0x202   :  { %v357_v11 = vadd.f32 %v356_v10, %v191_v8  ;;  %v358_v12 = vpop.f32.mrb[5].mxu1 }
 0x203   :  { %v359_v13 = vadd.f32 %v358_v12, %v195_v9  ;;  %v360_v14 = vpop.f32.mrb[6].mxu1 }
 0x204   :  { %v361_v15 = vpop.f32.mrb[7].mxu1 }
 0x205   :  { %v363_v16 = vmax.f32 %v357_v11, %v359_v13 }
 0x207   :  { %364 = vmax.xlane.f32.xlu0 %v363_v16 }
 0x294   :  { %v365_v26 = vpop.xlane.xlu0 %364 }
 0x295   :  { %v366_v27 = vsub.f32 %v357_v11, %v365_v26  ;;  %v367_v28 = vsub.f32 %v359_v13, %v365_v26 }
 0x297   :  { %v368_v29 = vmul.f32 1.442695, %v366_v27  ;;  %v370_v30 = vmul.f32 1.442695, %v367_v28 }
 0x299   :  { %798 = vpow2.f32 %v368_v29 }
 0x29a   :  { %800 = vpow2.f32 %v370_v30 }
 0x2a3   :  { %v799_v31 = vpop.eup %798 }
 0x2a4   :  { %v801_v32 = vpop.eup %800  ;;  %v372_v33 = vpack.c.bf16 %v799_v31, %v799_v31 }
 0x2a5   :  { %v373_v34 = vpack.c.bf16 %v801_v32, %v801_v32 }
 0x2a7   :  { %598 = vmatprep.mubr.bf16.mxu0 %v373_v34 }
 0x2a8   :  { %599 = vmatmul.mubr.bf16.vlgmr.msra.gmra.mrb[0].mxu0 %v372_v33 }
 0x37b   :  { %v600_v35 = vpop.f32.mrb[0].mxu0 }
 0x37c   :  { %v607_v36 = vmax.f32 %v600_v35, 1e-30  ;;  %v602_v37 = vpop.f32.mrb[1].mxu0 }
 0x37d   :  { %v608_v38 = vmax.f32 %v602_v37, 1e-30  ;;  %v604_v39 = vpop.f32.mrb[2].mxu0 }
 0x37e   :  { %802 = vrcp.f32 %v607_v36  ;;  %v605_v40 = vpop.f32.mrb[3].mxu0 }
 0x37f   :  { %804 = vrcp.f32 %v608_v38 }
 0x388   :  { %v803_v41 = vpop.eup %802 }
 0x389   :  { %v805_v42 = vpop.eup %804  ;;  %v611_v43 = vmul.f32 %v803_v41, %v607_v36 }
 0x38a   :  { %v612_v44 = vmul.f32 %v805_v42, %v608_v38 }
 0x38b   :  { %v613_v45 = vsub.f32 2.0, %v611_v43 }
 0x38c   :  { %v614_v46 = vsub.f32 2.0, %v612_v44 }
 0x38d   :  { %v615_v47 = vmul.f32 %v803_v41, %v613_v45 }
 0x38e   :  { %v616_v48 = vmul.f32 %v805_v42, %v614_v46 }
 0x38f   :  { %v617_v49 = vmul.f32 %v799_v31, %v615_v47 }
 0x390   :  { %v618_v50 = vmul.f32 %v801_v32, %v616_v48 }
 0x391   :  { %619 = vst [vmem:[#allocation10] sm:$0xff] %v617_v49 }
 0x392   :  { %620 = vst [vmem:[#allocation10 + $0x8] sm:$0xff] %v618_v50 }
 0x393   :  { %905 = shalt.err (!%p902_p8)
}
 0x394   :  { %s906_s21 = scalar_lea.hbm %s1054_s5, 256 }
 0x395   :  { %p907_p9 = scmp.ne.s32.totalorder %s1054_s5, %s906_s21  ;;  %p910_p10 = scmp.lt.u32.totalorder %s906_s21, %s1054_s5 }
 0x397   :  { %p912_p11 = pnand %p910_p10, %p907_p9 }
 0x399   :  { %915 = shalt.err (!%p912_p11)
}
 0x39a   :  { %630 = dma.vmem_to_hbm [thread:$0]  %s628_s1, 256, %s1054_s5, [#allocation4]  }
 0x39b   :  { %922 = dma.done.wait [#allocation4], 256  }
 0x39c   :  { %923 = vsyncadd [#allocation4], 4294967040 }
 0x39d   :  { %634 = vsyncpa [#allocation3], 1 }
 0x39e   :  { %635 = vsyncpa [#allocation6], 1 }
 0x39f   :  { %636 = vsyncpa [#allocation9], 1 }
 0x3a0   :  { %637 = vsyncpa [#allocation4], 1 }

</bundles_post_ra>
